<compile_context>
chip_gen: v6e
topology: v6e:2x2x1
jax: 0.10.0
libtpu: 0.0.40
codegen_flags: <defaults>
</compile_context>

<pallas_src>
import jax
import jax.numpy as jnp
import numpy as np
from jax.experimental import pallas as pl
from jax.experimental.pallas import tpu as pltpu


def _gelu_exact(x):
    # nn.GELU() default is the exact (erf) formulation.
    return 0.5 * x * (1.0 + jax.lax.erf(x / jnp.sqrt(2.0).astype(x.dtype)))


def _dfd_graphsage_kernel(x_ref, idx_ref, w1_ref, b1_ref, w2a_ref, w2b_ref,
                          b2_ref, o_ref):
    """One grid step handles a block of Bb batches flattened to M = Bb*N rows."""
    M, C = x_ref.shape[1], x_ref.shape[2]
    KM = idx_ref.shape[1]
    K = KM // M

    xf = x_ref[0]                                   # (M, C) original features

    # ---- nn1: 1x1 conv (C -> C) + exact GELU on center node features -------
    h1 = jnp.dot(xf, w1_ref[...], preferred_element_type=jnp.float32)
    h1 = _gelu_exact(h1 + b1_ref[...])              # (M, C)

    # ---- neighbor gather: ONE fused one-hot matmul over all K neighbors ----
    # idx_ref holds block-local flattened indices (b_local*N + idx), ordered
    # (k, b_local, n), shaped (K*M, 1).  One (K*M, M) @ (M, C) MXU call.
    cols = jax.lax.broadcasted_iota(jnp.int32, (KM, M), 1)           # (K*M, M)
    onehot = (idx_ref[0] == cols).astype(jnp.float32)                # (K*M, M)
    gathered = jnp.dot(onehot, xf, preferred_element_type=jnp.float32)  # (K*M, C)

    # max over K: K static, tile-aligned (M % 8 == 0) slices + elementwise max
    xj_max = gathered[0:M]
    for k in range(1, K):
        xj_max = jnp.maximum(xj_max, gathered[k * M:(k + 1) * M])    # (M, C)

    # ---- nn2: 1x1 conv (2C -> C_out_pad) + GELU -----------------------------
    # concat([h1, xj_max]) is folded into split weights so both halves stay
    # on the MXU (no sub-tile lane concat); output columns are padded to a
    # multiple of 128 so the final store is lane-dense.
    h2 = (jnp.dot(h1, w2a_ref[...], preferred_element_type=jnp.float32)
          + jnp.dot(xj_max, w2b_ref[...], preferred_element_type=jnp.float32)
          + b2_ref[...])
    o_ref[0] = jax.nn.sigmoid(_gelu_exact(h2)).astype(o_ref.dtype)


def dfd_graphsage_forward(x_nchw, edge_index, params, *, max_block_rows=512):
    """x_nchw: (B, C, N, 1) float32, edge_index: (2, B, N, K) int32."""
    B, C, N, _ = x_nchw.shape
    K = edge_index.shape[-1]
    C_out = params["w2"].shape[1]
    Cp = ((C_out + 127) // 128) * 128        # lane-dense (padded) output width

    # Fold batches into the matmul M dimension: largest divisor of B such that
    # the per-step slab (Bb*N rows) stays modest (keeps the one-hot in VMEM).
    Bb = 1
    for cand in range(1, B + 1):
        if B % cand == 0 and cand * N <= max(max_block_rows, N):
            Bb = cand
    nb = B // Bb
    M = Bb * N

    # ---- layout plumbing in XLA (free), so the kernel needs no reshapes ----
    x_bnc = jnp.transpose(x_nchw[..., 0], (0, 2, 1)).astype(jnp.float32)  # (B,N,C)
    x_flat = x_bnc.reshape(nb, M, C)                                      # (nb,M,C)

    idx = edge_index[0].astype(jnp.int32)                                 # (B,N,K)
    b_off = ((jnp.arange(B, dtype=jnp.int32) % Bb) * N)[:, None, None]
    lid = (idx + b_off).reshape(nb, Bb, N, K)
    lid = jnp.transpose(lid, (0, 3, 1, 2)).reshape(nb, K * M, 1)          # (nb,K*M,1)

    pad = Cp - C_out
    w2 = params["w2"]
    w2a = jnp.pad(w2[:C, :], ((0, 0), (0, pad)))   # acts on nn1(x)
    w2b = jnp.pad(w2[C:, :], ((0, 0), (0, pad)))   # acts on max-pooled neighbors
    b2p = jnp.pad(params["b2"], ((0, 0), (0, pad)))

    out_flat = pl.pallas_call(
        _dfd_graphsage_kernel,
        out_shape=jax.ShapeDtypeStruct((nb, M, Cp), jnp.float32),
        grid_spec=pltpu.PrefetchScalarGridSpec(
            num_scalar_prefetch=0,
            grid=(nb,),
            in_specs=[
                pl.BlockSpec((1, M, C), lambda g: (g, 0, 0)),        # x slab
                pl.BlockSpec((1, K * M, 1), lambda g: (g, 0, 0)),    # flat idx
                pl.BlockSpec((C, C), lambda g: (0, 0)),              # w1
                pl.BlockSpec((1, C), lambda g: (0, 0)),              # b1
                pl.BlockSpec((C, Cp), lambda g: (0, 0)),             # w2a (padded)
                pl.BlockSpec((C, Cp), lambda g: (0, 0)),             # w2b (padded)
                pl.BlockSpec((1, Cp), lambda g: (0, 0)),             # b2 (padded)
            ],
            out_specs=pl.BlockSpec((1, M, Cp), lambda g: (g, 0, 0)),
        ),
        compiler_params=pltpu.CompilerParams(
            dimension_semantics=("parallel",)),
    )(x_flat, lid, params["w1"], params["b1"], w2a, w2b, b2p)

    # strip lane padding, back to NCHW: (B, C_out, N, 1)
    out_bnc = out_flat.reshape(B, N, Cp)[..., :C_out]
    return jnp.transpose(out_bnc, (0, 2, 1))[..., None]


def _reference_forward(x_nchw, edge_index, params):
    """Pure-JAX reference with identical semantics (for validation)."""
    x_bnc = jnp.transpose(x_nchw[..., 0], (0, 2, 1))       # (B, N, C)
    idx = edge_index[0]                                     # (B, N, K)

    # gather neighbors from ORIGINAL x, then max over K
    x_j = jax.vmap(lambda xb, ib: xb[ib])(x_bnc, idx)       # (B, N, K, C)
    x_j_max = jnp.max(x_j, axis=2)                          # (B, N, C)

    h1 = _gelu_exact(jnp.einsum("bnc,co->bno", x_bnc, params["w1"])
                     + params["b1"])
    cat = jnp.concatenate([h1, x_j_max], axis=-1)           # (B, N, 2C)
    h2 = jnp.einsum("bnc,co->bno", cat, params["w2"]) + params["b2"]
    out = jax.nn.sigmoid(_gelu_exact(h2))                   # (B, N, C_out)
    return jnp.transpose(out, (0, 2, 1))[..., None]


def make_params(key, in_channels, out_channels):
    """Deterministic synthetic weights for the two 1x1 conv layers."""
    k1, k2, k3, k4 = jax.random.split(key, 4)
    C, Co = in_channels, out_channels
    return {
        "w1": jax.random.normal(k1, (C, C), jnp.float32) * 0.2,       # nn1 weight
        "b1": jax.random.normal(k2, (1, C), jnp.float32) * 0.1,       # nn1 bias
        "w2": jax.random.normal(k3, (2 * C, Co), jnp.float32) * 0.2,  # nn2 weight
        "b2": jax.random.normal(k4, (1, Co), jnp.float32) * 0.1,      # nn2 bias
    }


if __name__ == "__main__":
    B, C, N, K, C_OUT = 2, 4, 16, 4, 8

    key = jax.random.PRNGKey(0)
    kx, ke, kp = jax.random.split(key, 3)

    x = jax.random.normal(kx, (B, C, N, 1), jnp.float32)              # NCHW
    edge_index = jax.random.randint(ke, (2, B, N, K), 0, N, jnp.int32)
    params = make_params(kp, C, C_OUT)

    out = dfd_graphsage_forward(x, edge_index, params)
    out = jax.block_until_ready(out)

    ref = jax.block_until_ready(_reference_forward(x, edge_index, params))
    assert out.shape == (B, C_OUT, N, 1)
    assert np.allclose(np.asarray(out), np.asarray(ref), atol=1e-5, rtol=1e-5)

    print("KERNEL_OK")
</pallas_src>

<mosaic_0001>
module attributes {stable_mosaic.version = 11 : i64} {
  func.func @_dfd_graphsage_kernel(%arg0: i32, %arg1: memref<1x32x4xf32, #tpu.memory_space<vmem>>, %arg2: memref<1x128x1xi32, #tpu.memory_space<vmem>>, %arg3: memref<4x4xf32, #tpu.memory_space<vmem>>, %arg4: memref<1x4xf32, #tpu.memory_space<vmem>>, %arg5: memref<4x128xf32, #tpu.memory_space<vmem>>, %arg6: memref<4x128xf32, #tpu.memory_space<vmem>>, %arg7: memref<1x128xf32, #tpu.memory_space<vmem>>, %arg8: memref<1x32x128xf32, #tpu.memory_space<vmem>>) attributes {dimension_semantics = [#tpu.dimension_semantics<parallel>], iteration_bounds = array<i64: 1>, scalar_prefetch = 0 : i64, scratch_operands = 0 : i64, tpu.core_type = #tpu.core_type<tc>, window_params = [{transform_indices = @transform_0, window_bounds = array<i64: 1, 32, 4>}, {transform_indices = @transform_1, window_bounds = array<i64: 1, 128, 1>}, {pipeline_mode = #tpu.pipeline_mode<synchronous>, transform_indices = @transform_2, window_bounds = array<i64: 4, 4>}, {pipeline_mode = #tpu.pipeline_mode<synchronous>, transform_indices = @transform_3, window_bounds = array<i64: 1, 4>}, {pipeline_mode = #tpu.pipeline_mode<synchronous>, transform_indices = @transform_4, window_bounds = array<i64: 4, 128>}, {pipeline_mode = #tpu.pipeline_mode<synchronous>, transform_indices = @transform_5, window_bounds = array<i64: 4, 128>}, {pipeline_mode = #tpu.pipeline_mode<synchronous>, transform_indices = @transform_6, window_bounds = array<i64: 1, 128>}, {transform_indices = @transform_7, window_bounds = array<i64: 1, 32, 128>}]} {
    %c0 = arith.constant 0 : index
    %c0_0 = arith.constant 0 : index
    %c0_1 = arith.constant 0 : index
    %0 = vector.load %arg1[%c0, %c0_0, %c0_1] : memref<1x32x4xf32, #tpu.memory_space<vmem>>, vector<1x32x4xf32>
    %1 = vector.shape_cast %0 : vector<1x32x4xf32> to vector<32x4xf32>
    %c0_2 = arith.constant 0 : index
    %c0_3 = arith.constant 0 : index
    %2 = vector.load %arg3[%c0_2, %c0_3] : memref<4x4xf32, #tpu.memory_space<vmem>>, vector<4x4xf32>
    %cst = arith.constant dense<0.000000e+00> : vector<32x4xf32>
    %3 = tpu.matmul %1, %2, %cst {dimension_numbers = #tpu.dot_dimension_numbers<[1], [0], [0], [1], [0, 0, 1, 1], [], []>} : vector<32x4xf32>, vector<4x4xf32>, vector<32x4xf32> -> vector<32x4xf32>
    %c0_4 = arith.constant 0 : index
    %c0_5 = arith.constant 0 : index
    %4 = vector.load %arg4[%c0_4, %c0_5] : memref<1x4xf32, #tpu.memory_space<vmem>>, vector<1x4xf32>
    %5 = vector.broadcast %4 : vector<1x4xf32> to vector<32x4xf32>
    %6 = arith.addf %3, %5 : vector<32x4xf32>
    %cst_6 = arith.constant 5.000000e-01 : f32
    %7 = vector.broadcast %cst_6 : f32 to vector<32x4xf32>
    %8 = arith.mulf %7, %6 : vector<32x4xf32>
    %cst_7 = arith.constant 2.000000e+00 : f32
    %9 = math.sqrt %cst_7 : f32
    %10 = vector.broadcast %9 : f32 to vector<32x4xf32>
    %11 = arith.divf %6, %10 : vector<32x4xf32>
    %12 = math.erf %11 : vector<32x4xf32>
    %cst_8 = arith.constant 1.000000e+00 : f32
    %13 = vector.broadcast %cst_8 : f32 to vector<32x4xf32>
    %14 = arith.addf %13, %12 : vector<32x4xf32>
    %15 = arith.mulf %8, %14 : vector<32x4xf32>
    %16 = tpu.iota {dimensions = array<i32: 1>} : vector<128x32xi32>
    %c0_9 = arith.constant 0 : index
    %c0_10 = arith.constant 0 : index
    %c0_11 = arith.constant 0 : index
    %17 = vector.load %arg2[%c0_9, %c0_10, %c0_11] : memref<1x128x1xi32, #tpu.memory_space<vmem>>, vector<1x128x1xi32>
    %18 = vector.shape_cast %17 : vector<1x128x1xi32> to vector<128x1xi32>
    %19 = vector.broadcast %18 : vector<128x1xi32> to vector<128x32xi32>
    %20 = arith.cmpi eq, %19, %16 : vector<128x32xi32>
    %21 = arith.extui %20 : vector<128x32xi1> to vector<128x32xi32>
    %22 = arith.sitofp %21 : vector<128x32xi32> to vector<128x32xf32>
    %cst_12 = arith.constant dense<0.000000e+00> : vector<128x4xf32>
    %23 = tpu.matmul %22, %1, %cst_12 {dimension_numbers = #tpu.dot_dimension_numbers<[1], [0], [0], [1], [0, 0, 1, 1], [], []>} : vector<128x32xf32>, vector<32x4xf32>, vector<128x4xf32> -> vector<128x4xf32>
    %24 = vector.extract_strided_slice %23 {offsets = [0, 0], sizes = [32, 4], strides = [1, 1]} : vector<128x4xf32> to vector<32x4xf32>
    %25 = vector.extract_strided_slice %23 {offsets = [32, 0], sizes = [32, 4], strides = [1, 1]} : vector<128x4xf32> to vector<32x4xf32>
    %26 = arith.maximumf %24, %25 : vector<32x4xf32>
    %27 = vector.extract_strided_slice %23 {offsets = [64, 0], sizes = [32, 4], strides = [1, 1]} : vector<128x4xf32> to vector<32x4xf32>
    %28 = arith.maximumf %26, %27 : vector<32x4xf32>
    %29 = vector.extract_strided_slice %23 {offsets = [96, 0], sizes = [32, 4], strides = [1, 1]} : vector<128x4xf32> to vector<32x4xf32>
    %30 = arith.maximumf %28, %29 : vector<32x4xf32>
    %c0_13 = arith.constant 0 : index
    %c0_14 = arith.constant 0 : index
    %31 = vector.load %arg5[%c0_13, %c0_14] : memref<4x128xf32, #tpu.memory_space<vmem>>, vector<4x128xf32>
    %cst_15 = arith.constant dense<0.000000e+00> : vector<32x128xf32>
    %32 = tpu.matmul %15, %31, %cst_15 {dimension_numbers = #tpu.dot_dimension_numbers<[1], [0], [0], [1], [0, 0, 1, 1], [], []>} : vector<32x4xf32>, vector<4x128xf32>, vector<32x128xf32> -> vector<32x128xf32>
    %c0_16 = arith.constant 0 : index
    %c0_17 = arith.constant 0 : index
    %33 = vector.load %arg6[%c0_16, %c0_17] : memref<4x128xf32, #tpu.memory_space<vmem>>, vector<4x128xf32>
    %cst_18 = arith.constant dense<0.000000e+00> : vector<32x128xf32>
    %34 = tpu.matmul %30, %33, %cst_18 {dimension_numbers = #tpu.dot_dimension_numbers<[1], [0], [0], [1], [0, 0, 1, 1], [], []>} : vector<32x4xf32>, vector<4x128xf32>, vector<32x128xf32> -> vector<32x128xf32>
    %35 = arith.addf %32, %34 : vector<32x128xf32>
    %c0_19 = arith.constant 0 : index
    %c0_20 = arith.constant 0 : index
    %36 = vector.load %arg7[%c0_19, %c0_20] : memref<1x128xf32, #tpu.memory_space<vmem>>, vector<1x128xf32>
    %37 = vector.broadcast %36 : vector<1x128xf32> to vector<32x128xf32>
    %38 = arith.addf %35, %37 : vector<32x128xf32>
    %cst_21 = arith.constant 5.000000e-01 : f32
    %39 = vector.broadcast %cst_21 : f32 to vector<32x128xf32>
    %40 = arith.mulf %39, %38 : vector<32x128xf32>
    %cst_22 = arith.constant 2.000000e+00 : f32
    %41 = math.sqrt %cst_22 : f32
    %42 = vector.broadcast %41 : f32 to vector<32x128xf32>
    %43 = arith.divf %38, %42 : vector<32x128xf32>
    %44 = math.erf %43 : vector<32x128xf32>
    %cst_23 = arith.constant 1.000000e+00 : f32
    %45 = vector.broadcast %cst_23 : f32 to vector<32x128xf32>
    %46 = arith.addf %45, %44 : vector<32x128xf32>
    %47 = arith.mulf %40, %46 : vector<32x128xf32>
    %48 = arith.negf %47 : vector<32x128xf32>
    %49 = math.exp %48 : vector<32x128xf32>
    %cst_24 = arith.constant 1.000000e+00 : f32
    %50 = vector.broadcast %cst_24 : f32 to vector<32x128xf32>
    %51 = arith.addf %50, %49 : vector<32x128xf32>
    %52 = arith.divf %50, %51 : vector<32x128xf32>
    %c0_25 = arith.constant 0 : index
    %c0_26 = arith.constant 0 : index
    %c0_27 = arith.constant 0 : index
    %53 = vector.load %arg8[%c0_25, %c0_26, %c0_27] : memref<1x32x128xf32, #tpu.memory_space<vmem>>, vector<1x32x128xf32>
    %54 = vector.shape_cast %53 : vector<1x32x128xf32> to vector<32x128xf32>
    %55 = vector.shape_cast %52 : vector<32x128xf32> to vector<1x32x128xf32>
    tpu.vector_store %arg8[%c0_25, %c0_26, %c0_27], %55 {strides = array<i32>} : memref<1x32x128xf32, #tpu.memory_space<vmem>>, vector<1x32x128xf32>,
    return
  }
  func.func @transform_0(%arg0: i32) -> (i32, i32, i32) {
    %c0_i32 = arith.constant 0 : i32
    %c0_i32_0 = arith.constant 0 : i32
    %c0_i32_1 = arith.constant 0 : i32
    return %arg0, %c0_i32, %c0_i32_0 : i32, i32, i32
  }
  func.func @transform_1(%arg0: i32) -> (i32, i32, i32) {
    %c0_i32 = arith.constant 0 : i32
    %c0_i32_0 = arith.constant 0 : i32
    %c0_i32_1 = arith.constant 0 : i32
    return %arg0, %c0_i32, %c0_i32_0 : i32, i32, i32
  }
  func.func @transform_2(%arg0: i32) -> (i32, i32) {
    %c0_i32 = arith.constant 0 : i32
    %c0_i32_0 = arith.constant 0 : i32
    %c0_i32_1 = arith.constant 0 : i32
    return %c0_i32, %c0_i32_0 : i32, i32
  }
  func.func @transform_3(%arg0: i32) -> (i32, i32) {
    %c0_i32 = arith.constant 0 : i32
    %c0_i32_0 = arith.constant 0 : i32
    %c0_i32_1 = arith.constant 0 : i32
    return %c0_i32, %c0_i32_0 : i32, i32
  }
  func.func @transform_4(%arg0: i32) -> (i32, i32) {
    %c0_i32 = arith.constant 0 : i32
    %c0_i32_0 = arith.constant 0 : i32
    %c0_i32_1 = arith.constant 0 : i32
    return %c0_i32, %c0_i32_0 : i32, i32
  }
  func.func @transform_5(%arg0: i32) -> (i32, i32) {
    %c0_i32 = arith.constant 0 : i32
    %c0_i32_0 = arith.constant 0 : i32
    %c0_i32_1 = arith.constant 0 : i32
    return %c0_i32, %c0_i32_0 : i32, i32
  }
  func.func @transform_6(%arg0: i32) -> (i32, i32) {
    %c0_i32 = arith.constant 0 : i32
    %c0_i32_0 = arith.constant 0 : i32
    %c0_i32_1 = arith.constant 0 : i32
    return %c0_i32, %c0_i32_0 : i32, i32
  }
  func.func @transform_7(%arg0: i32) -> (i32, i32, i32) {
    %c0_i32 = arith.constant 0 : i32
    %c0_i32_0 = arith.constant 0 : i32
    %c0_i32_1 = arith.constant 0 : i32
    return %arg0, %c0_i32, %c0_i32_0 : i32, i32, i32
  }
}

</mosaic_0001>

<bundles_post_ra>
// kernel: tpu_custom_call.1
= control target key start
LH: loop header
LB: loop body
LE: loop exit
PB: predicated region body
PF: predicated region fallthrough
CT: control target
= control target key end

     0   :  { %v972_v2 = vmov 0   ;;  %vm52_vm0 = vcmask 1043456   ;;  %vm39_vm1 = vcmask 31744   ;;  %s1147_s0 = inlined_call_operand.vmem [shape: f32[1,32,4], index: 0, kind: input, shape index: {}]   ;;  %s1148_s1 = inlined_call_operand.vmem [shape: s32[1,128,1], index: 1, kind: input, shape index: {}]   ;;  %s1149_s2 = inlined_call_operand.vmem [shape: f32[4,4], index: 2, kind: input, shape index: {}]   ;;  %s1150_s3 = inlined_call_operand.vmem [shape: f32[1,4], index: 3, kind: input, shape index: {}]   ;;  %s1151_s4 = inlined_call_operand.vmem [shape: f32[4,128], index: 4, kind: input, shape index: {}]   ;;  %s1152_s5 = inlined_call_operand.vmem [shape: f32[4,128], index: 5, kind: input, shape index: {}]   ;;  %s1153_s6 = inlined_call_operand.vmem [shape: f32[1,128], index: 6, kind: input, shape index: {}]   ;;  %s1154_s7 = inlined_call_operand.hbm [shape: f32[1,32,128], index: 7, kind: output, shape index: {}]  }
   0x1   :  { %v168_v0 = vld [vmem:[%s1148_s1 + $0x20] sm:$0xff]  ;;  %v166_v1 = vld [vmem:[%s1148_s1 + $0x10] sm:$0xff]  ;;  %917 = vset.pattern.permute.xlu1 %v972_v2  ;;  %916 = vset.pattern.permute.xlu0 %v972_v2  ;;  %v169_v3 = vld [vmem:[%s1148_s1 + $0x28] sm:$0xff] }
   0x2   :  { %193 = vperm.xlu1 %917, %v168_v0   ;;  %187 = vperm.xlu0 %916, %v166_v1   ;;  %v167_v4 = vld [vmem:[%s1148_s1 + $0x18] sm:$0xff]  ;;  %v31_v5 = vld [vmem:[%s1149_s2] sm:$0xf]  ;;  %v28_v7 = vld [vmem:[%s1147_s0 + $0x8] sm:$0xff] }
   0x3   :  { %v27_v6 = vld [vmem:[%s1147_s0] sm:$0xff]  ;;  %v30_v8 = vld [vmem:[%s1147_s0 + $0x18] sm:$0xff]  ;;  %v170_v10 = vld [vmem:[%s1148_s1 + $0x30] sm:$0xff]  ;;  %847 = vmatprep.subr.msk.mxu0 %vm52_vm0, %v31_v5 }
   0x4   :  { %v171_v9 = vld [vmem:[%s1148_s1 + $0x38] sm:$0xff]  ;;  %849 = vmatprep.mubr.msk.f32.mxu0 %vm39_vm1, %v27_v6 }
   0x6   :  { %196 = vperm.xlu1 %917, %v169_v3   ;;  %190 = vperm.xlu0 %916, %v167_v4  }
   0x7   :  { %12 = vsyncpa [#allocation3], 0  ;;  %848 = vmatpush3.msk.msra.mxu0 %vm52_vm0, %v31_v5  ;;  %903 = vmatprep.subr.mxu1 %v30_v8  ;;  %v29_v11 = vld [vmem:[%s1147_s0 + $0x10] sm:$0xff]  ;;  %v173_v12 = vld [vmem:[%s1148_s1 + $0x48] sm:$0xff]  ;;  %v162_v22 = vlaneseq  ;;  %vm276_vm2 = vcmask 261120   ;;  %v973_v26 = vmov 0.0  }
   0x8   :  { %850 = vmatmul.mubr.msk.f32.vlgmr.msra.gmra.mxu0 %vm39_vm1, %v28_v7  ;;  %907 = vmatpush3.msra.mxu1 %v30_v8  ;;  %v172_v13 = vld [vmem:[%s1148_s1 + $0x40] sm:$0xff]  ;;  %v174_v14 = vld [vmem:[%s1148_s1 + $0x50] sm:$0xff]  ;;  %v175_v16 = vld [vmem:[%s1148_s1 + $0x58] sm:$0xff] }
   0x9   :  { %852 = vmatprep.mubr.msk.f32.mxu0 %vm39_vm1, %v29_v11  ;;  %904 = vmatprep.subr.mxu1 %v29_v11  ;;  %v164_v15 = vld [vmem:[%s1148_s1] sm:$0xff]  ;;  %v165_v17 = vld [vmem:[%s1148_s1 + $0x8] sm:$0xff]  ;;  %v179_v20 = vld [vmem:[%s1148_s1 + $0x78] sm:$0xff]  ;;  %v1086_v23 = vand.u32 127, %v162_v22 }
   0xa   :  { %202 = vperm.xlu1 %917, %v171_v9   ;;  %199 = vperm.xlu0 %916, %v170_v10   ;;  %v177_v18 = vld [vmem:[%s1148_s1 + $0x68] sm:$0xff]  ;;  %v176_v19 = vld [vmem:[%s1148_s1 + $0x60] sm:$0xff]  ;;  %v178_v21 = vld [vmem:[%s1148_s1 + $0x70] sm:$0xff] }
   0xb   :  { %908 = vmatpush3.msra.mxu1 %v29_v11  ;;  %855 = vmatprep.subr.mxu0 %v30_v8  ;;  %v483_v57 = vld [vmem:[%s1152_s5] sm:$0xf]  ;;  %s974_s5 = smov [#allocation2]  }
   0xc   :  { %853 = vmatmul.mubr.msk.f32.gmra.mxu0 %vm39_vm1, %v30_v8  ;;  %905 = vmatprep.subr.mxu1 %v28_v7  ;;  %v482_v58 = vld [vmem:[%s1151_s4] sm:$0xf] }
   0xd   :  { %909 = vmatpush3.msra.mxu1 %v28_v7  ;;  %856 = vmatpush3.msra.mxu0 %v30_v8  ;;  %v759_v61 = vld [vmem:[%s1150_s3] ss:$0 sm:$0xff] }
   0xe   :  { %208 = vperm.xlu1 %917, %v173_v12   ;;  %205 = vperm.xlu0 %916, %v172_v13  }
   0xf   :  { %906 = vmatprep.subr.mxu1 %v27_v6  ;;  %857 = vmatprep.subr.mxu0 %v29_v11 }
  0x10   :  { %910 = vmatpush3.msra.mxu1 %v27_v6  ;;  %858 = vmatpush3.msra.mxu0 %v29_v11 }
  0x11   :  { %859 = vmatprep.subr.mxu0 %v28_v7 }
  0x12   :  { %211 = vperm.xlu1 %917, %v174_v14   ;;  %181 = vperm.xlu0 %916, %v164_v15  }
  0x13   :  { %860 = vmatpush3.msra.mxu0 %v28_v7 }
  0x14   :  { %861 = vmatprep.subr.mxu0 %v27_v6 }
  0x15   :  { %862 = vmatpush3.msra.mxu0 %v27_v6 }
  0x16   :  { %214 = vperm.xlu1 %917, %v175_v16   ;;  %184 = vperm.xlu0 %916, %v165_v17  }
  0x17   :  { %887 = vmatprep.subr.msk.mxu0 %vm52_vm0, %v483_v57 }
  0x1a   :  { %220 = vperm.xlu1 %917, %v177_v18   ;;  %217 = vperm.xlu0 %916, %v176_v19  }
  0x1e   :  { %226 = vperm.xlu1 %917, %v179_v20   ;;  %223 = vperm.xlu0 %916, %v178_v21  }
  0x7d   :  { %v194_v24 = vpop.permute.xlu1 %193  ;;  %v188_v25 = vpop.permute.xlu0 %187 }
  0x7e   :  { %vm230_vm3 = vcmp.eq.s32.totalorder %v188_v25, %v1086_v23  ;;  %vm232_vm4 = vcmp.eq.s32.totalorder %v194_v24, %v1086_v23 }
  0x7f   :  { %v767_v27 = vsel %vm230_vm3, 1.0, %v973_v26  ;;  %v769_v31 = vsel %vm232_vm4, 1.0, %v973_v26 }
  0x80   :  { %866 = vmatprep.mubr.msk.f32.mxu1 %vm276_vm2, %v767_v27 }
  0x81   :  { %v197_v28 = vpop.permute.xlu1 %196  ;;  %v191_v29 = vpop.permute.xlu0 %190 }
  0x82   :  { %vm231_vm5 = vcmp.eq.s32.totalorder %v191_v29, %v1086_v23  ;;  %vm233_vm6 = vcmp.eq.s32.totalorder %v197_v28, %v1086_v23 }
  0x83   :  { %v768_v30 = vsel %vm231_vm5, 1.0, %v973_v26  ;;  %v770_v34 = vsel %vm233_vm6, 1.0, %v973_v26 }
  0x84   :  { %867 = vmatmul.mubr.msk.f32.vlgmr.msra.gmra.mxu1 %vm276_vm2, %v768_v30 }
  0x85   :  { %v203_v32 = vpop.permute.xlu1 %202  ;;  %v200_v33 = vpop.permute.xlu0 %199  ;;  %869 = vmatprep.mubr.msk.f32.mxu1 %vm276_vm2, %v769_v31 }
  0x86   :  { %vm234_vm7 = vcmp.eq.s32.totalorder %v200_v33, %v1086_v23  ;;  %vm235_vm8 = vcmp.eq.s32.totalorder %v203_v32, %v1086_v23 }
  0x87   :  { %v771_v35 = vsel %vm234_vm7, 1.0, %v973_v26  ;;  %v772_v38 = vsel %vm235_vm8, 1.0, %v973_v26 }
  0x88   :  { %870 = vmatmul.mubr.msk.f32.gmra.mxu1 %vm276_vm2, %v770_v34 }
  0x89   :  { %v209_v36 = vpop.permute.xlu1 %208  ;;  %v206_v37 = vpop.permute.xlu0 %205  ;;  %872 = vmatprep.mubr.msk.f32.mxu1 %vm276_vm2, %v771_v35 }
  0x8a   :  { %vm236_vm9 = vcmp.eq.s32.totalorder %v206_v37, %v1086_v23  ;;  %vm237_vm10 = vcmp.eq.s32.totalorder %v209_v36, %v1086_v23 }
  0x8b   :  { %v773_v39 = vsel %vm236_vm9, 1.0, %v973_v26  ;;  %v774_v42 = vsel %vm237_vm10, 1.0, %v973_v26 }
  0x8c   :  { %873 = vmatmul.mubr.msk.f32.gmra.mxu1 %vm276_vm2, %v772_v38 }
  0x8d   :  { %v212_v40 = vpop.permute.xlu1 %211  ;;  %v182_v41 = vpop.permute.xlu0 %181  ;;  %875 = vmatprep.mubr.msk.f32.mxu1 %vm276_vm2, %v773_v39 }
  0x8e   :  { %vm238_vm11 = vcmp.eq.s32.totalorder %v212_v40, %v1086_v23  ;;  %vm228_vm12 = vcmp.eq.s32.totalorder %v182_v41, %v1086_v23 }
  0x8f   :  { %v775_v43 = vsel %vm238_vm11, 1.0, %v973_v26  ;;  %v765_v44 = vsel %vm228_vm12, 1.0, %v973_v26 }
  0x90   :  { %863 = vmatprep.mubr.msk.f32.mxu0 %vm276_vm2, %v765_v44  ;;  %876 = vmatmul.mubr.msk.f32.gmra.mxu1 %vm276_vm2, %v774_v42 }
  0x91   :  { %v215_v45 = vpop.permute.xlu1 %214  ;;  %v185_v46 = vpop.permute.xlu0 %184  ;;  %878 = vmatprep.mubr.msk.f32.mxu1 %vm276_vm2, %v775_v43 }
  0x92   :  { %vm239_vm13 = vcmp.eq.s32.totalorder %v215_v45, %v1086_v23  ;;  %vm229_vm14 = vcmp.eq.s32.totalorder %v185_v46, %v1086_v23 }
  0x93   :  { %v776_v47 = vsel %vm239_vm13, 1.0, %v973_v26  ;;  %v766_v48 = vsel %vm229_vm14, 1.0, %v973_v26 }
  0x94   :  { %864 = vmatmul.mubr.msk.f32.vlgmr.msra.gmra.mxu0 %vm276_vm2, %v766_v48  ;;  %879 = vmatmul.mubr.msk.f32.gmra.mxu1 %vm276_vm2, %v776_v47 }
  0x95   :  { %v221_v49 = vpop.permute.xlu1 %220  ;;  %v218_v50 = vpop.permute.xlu0 %217  ;;  %888 = vmatpush3.msk.msra.mxu0 %vm52_vm0, %v483_v57  ;;  %v807_v57 = vld [vmem:[%s1153_s6] ss:$0 sm:$0xff]  ;;  %s748_s6 = sshll.u32 %s974_s5, 4  ;;  %s749_s6 = int_to_ptr.vmem [resolvable:$true] %s748_s6 }
  0x96   :  { %vm241_vm15 = vcmp.eq.s32.totalorder %v221_v49, %v1086_v23  ;;  %vm240_vm3 = vcmp.eq.s32.totalorder %v218_v50, %v1086_v23  ;;  %895 = vmatprep.subr.msk.mxu0 %vm52_vm0, %v482_v58  ;;  %s950_s22 = scalar_lea.vmem %s749_s6, 512  ;;  %p955_p1 = scmp.lt.s32.totalorder %s749_s6, %s749_s6 }
  0x97   :  { %v778_v51 = vsel %vm241_vm15, 1.0, %v973_v26  ;;  %v777_v52 = vsel %vm240_vm3, 1.0, %v973_v26  ;;  %p951_p0 = scmp.ne.s32.totalorder %s749_s6, %s950_s22  ;;  %p956_p2 = scmp.lt.s32.totalorder %s950_s22, %s950_s22 }
  0x98   :  { %881 = vmatprep.mubr.msk.f32.mxu1 %vm276_vm2, %v777_v52 }
  0x99   :  { %v227_v53 = vpop.permute.xlu1 %226  ;;  %v224_v54 = vpop.permute.xlu0 %223  ;;  %882 = vmatmul.mubr.msk.f32.gmra.mxu1 %vm276_vm2, %v778_v51  ;;  %p957_p3 = por %p956_p2, %p955_p1 }
  0x9a   :  { %vm243_vm4 = vcmp.eq.s32.totalorder %v227_v53, %v1086_v23  ;;  %vm242_vm5 = vcmp.eq.s32.totalorder %v224_v54, %v1086_v23 }
  0x9b   :  { %v780_v55 = vsel %vm243_vm4, 1.0, %v973_v26  ;;  %v779_v56 = vsel %vm242_vm5, 1.0, %v973_v26  ;;  %p958_p4 = pnand %p957_p3, %p951_p0 }
  0x9c   :  { %884 = vmatprep.mubr.msk.f32.mxu1 %vm276_vm2, %v779_v56 }
  0x9d   :  { %885 = vmatmul.mubr.msk.f32.gmra.mxu1 %vm276_vm2, %v780_v55 }
  0xc8   :  { %v851_v59 = vpop.f32.mrf.mxu0 }
  0xc9   :  { %v128_v4 = vadd.f32 %v851_v59, %v759_v61 }
  0xca   :  { %v122_v60 = vpop.f32.mrf.mxu0 }
  0xcb   :  { %v123_v0 = vadd.f32 %v759_v61, %v122_v60  ;;  %v147_v9 = vmul.f32 0.70710677, %v128_v4  ;;  %v142_v40 = vmul.f32 0.5, %v128_v4 }
  0xcc   :  { %v854_v62 = vpop.f32.mrf.mxu0 }
  0xcd   :  { %v146_v5 = vmul.f32 0.70710677, %v123_v0  ;;  %v138_v10 = vadd.f32 %v854_v62, %v759_v61  ;;  %v141_v33 = vmul.f32 0.5, %v123_v0 }
  0xce   :  { %v132_v2 = vpop.f32.mrf.mxu0 }
  0xcf   :  { %v133_v6 = vadd.f32 %v759_v61, %v132_v2  ;;  %918 = verf.f32 %v146_v5  ;;  %v149_v14 = vmul.f32 0.70710677, %v138_v10  ;;  %v144_v48 = vmul.f32 0.5, %v138_v10 }
  0xd0   :  { %920 = verf.f32 %v147_v9 }
  0xd1   :  { %v148_v11 = vmul.f32 0.70710677, %v133_v6  ;;  %v143_v45 = vmul.f32 0.5, %v133_v6 }
  0xd3   :  { %922 = verf.f32 %v148_v11 }
  0xd4   :  { %924 = verf.f32 %v149_v14 }
  0xdc   :  { %v919_v25 = vpop.eup %918 }
  0xdd   :  { %v921_v32 = vpop.eup %920  ;;  %v154_v34 = vadd.f32 1.0, %v919_v25 }
  0xde   :  { %v155_v41 = vadd.f32 1.0, %v921_v32 }
  0xdf   :  { %v158_v44 = vmul.f32 %v154_v34, %v141_v33 }
  0xe0   :  { %v923_v36 = vpop.eup %922  ;;  %v159_v47 = vmul.f32 %v155_v41, %v142_v40 }
  0xe1   :  { %v925_v43 = vpop.eup %924  ;;  %v156_v46 = vadd.f32 1.0, %v923_v36 }
  0xe2   :  { %v157_v49 = vadd.f32 1.0, %v925_v43 }
  0xe3   :  { %v160_v50 = vmul.f32 %v156_v46, %v143_v45 }
  0xe4   :  { %v161_v51 = vmul.f32 %v157_v49, %v144_v48 }
 0x144   :  { %v868_v63 = vpop.f32.mrf.mxu1 }
 0x146   :  { %v401_v1 = vpop.f32.mrf.mxu1 }
 0x148   :  { %v871_v3 = vpop.f32.mrf.mxu1 }
 0x14a   :  { %v411_v7 = vpop.f32.mrf.mxu1 }
 0x14c   :  { %v874_v8 = vpop.f32.mrf.mxu1 }
 0x14d   :  { %v473_v29 = vmax.f32 %v868_v63, %v874_v8 }
 0x14e   :  { %v421_v12 = vpop.f32.mrf.mxu1 }
 0x14f   :  { %v472_v27 = vmax.f32 %v401_v1, %v421_v12 }
 0x150   :  { %v877_v13 = vpop.f32.mrf.mxu1 }
 0x152   :  { %v431_v15 = vpop.f32.mrf.mxu1 }
 0x154   :  { %v865_v16 = vpop.f32.mrf.mxu0  ;;  %v880_v17 = vpop.f32.mrf.mxu1 }
 0x155   :  { %v471_v18 = vmax.f32 %v865_v16, %v871_v3  ;;  %v477_v37 = vmax.f32 %v473_v29, %v880_v17 }
 0x156   :  { %v391_v19 = vpop.f32.mrf.mxu0  ;;  %v441_v20 = vpop.f32.mrf.mxu1 }
 0x157   :  { %v470_v21 = vmax.f32 %v391_v19, %v411_v7  ;;  %v475_v23 = vmax.f32 %v471_v18, %v877_v13  ;;  %v476_v35 = vmax.f32 %v472_v27, %v441_v20 }
 0x159   :  { %v883_v22 = vpop.f32.mrf.mxu1  ;;  %v474_v24 = vmax.f32 %v470_v21, %v431_v15 }
 0x15a   :  { %v479_v30 = vmax.f32 %v475_v23, %v883_v22 }
 0x15b   :  { %v451_v26 = vpop.f32.mrf.mxu1 }
 0x15c   :  { %v478_v28 = vmax.f32 %v474_v24, %v451_v26 }
 0x15d   :  { %v886_v31 = vpop.f32.mrf.mxu1 }
 0x15e   :  { %889 = vmatprep.mubr.msk.f32.mxu0 %vm39_vm1, %v478_v28  ;;  %v481_v42 = vmax.f32 %v477_v37, %v886_v31 }
 0x15f   :  { %v461_v38 = vpop.f32.mrf.mxu1  ;;  %890 = vmatmul.mubr.msk.f32.vlgmr.msra.gmra.mxu0 %vm39_vm1, %v479_v30 }
 0x160   :  { %v480_v39 = vmax.f32 %v476_v35, %v461_v38  ;;  %896 = vmatpush3.msk.msra.mxu0 %vm52_vm0, %v482_v58 }
 0x162   :  { %892 = vmatprep.mubr.msk.f32.mxu0 %vm39_vm1, %v480_v39 }
 0x163   :  { %893 = vmatmul.mubr.msk.f32.gmra.mxu0 %vm39_vm1, %v481_v42 }
 0x164   :  { %897 = vmatprep.mubr.msk.f32.mxu0 %vm39_vm1, %v158_v44 }
 0x167   :  { %898 = vmatmul.mubr.msk.f32.vlgmr.msra.gmra.mxu0 %vm39_vm1, %v159_v47 }
 0x168   :  { %900 = vmatprep.mubr.msk.f32.mxu0 %vm39_vm1, %v160_v50 }
 0x16b   :  { %901 = vmatmul.mubr.msk.f32.gmra.mxu0 %vm39_vm1, %v161_v51 }
 0x21f   :  { %v891_v52 = vpop.f32.mrf.mxu0 }
 0x221   :  { %v565_v53 = vpop.f32.mrf.mxu0 }
 0x223   :  { %v894_v54 = vpop.f32.mrf.mxu0 }
 0x225   :  { %v575_v55 = vpop.f32.mrf.mxu0 }
 0x227   :  { %v899_v56 = vpop.f32.mrf.mxu0 }
 0x228   :  { %v671_v58 = vadd.f32 %v899_v56, %v891_v52 }
 0x229   :  { %v665_v59 = vpop.f32.mrf.mxu0 }
 0x22a   :  { %v692_v60 = vadd.f32 %v807_v57, %v671_v58  ;;  %v666_v61 = vadd.f32 %v665_v59, %v565_v53 }
 0x22b   :  { %v902_v62 = vpop.f32.mrf.mxu0 }
 0x22c   :  { %v700_v63 = vmul.f32 0.70710677, %v692_v60  ;;  %v691_v0 = vadd.f32 %v807_v57, %v666_v61  ;;  %v681_v1 = vadd.f32 %v902_v62, %v894_v54  ;;  %v696_v10 = vmul.f32 0.5, %v692_v60 }
 0x22d   :  { %v675_v2 = vpop.f32.mrf.mxu0 }
 0x22e   :  { %926 = verf.f32 %v700_v63  ;;  %v699_v3 = vmul.f32 0.70710677, %v691_v0  ;;  %v694_v4 = vadd.f32 %v807_v57, %v681_v1  ;;  %v676_v5 = vadd.f32 %v675_v2, %v575_v55 }
 0x22f   :  { %v695_v14 = vmul.f32 0.5, %v691_v0 }
 0x230   :  { %928 = verf.f32 %v699_v3  ;;  %v702_v6 = vmul.f32 0.70710677, %v694_v4  ;;  %v693_v7 = vadd.f32 %v807_v57, %v676_v5  ;;  %v698_v19 = vmul.f32 0.5, %v694_v4 }
 0x232   :  { %930 = verf.f32 %v702_v6  ;;  %v701_v8 = vmul.f32 0.70710677, %v693_v7  ;;  %v697_v24 = vmul.f32 0.5, %v693_v7 }
 0x234   :  { %932 = verf.f32 %v701_v8 }
 0x23b   :  { %v927_v9 = vpop.eup %926 }
 0x23c   :  { %v708_v11 = vadd.f32 1.0, %v927_v9 }
 0x23d   :  { %v929_v12 = vpop.eup %928 }
 0x23e   :  { %v712_v13 = vmul.f32 %v708_v11, %v696_v10  ;;  %v707_v15 = vadd.f32 1.0, %v929_v12 }
 0x23f   :  { %v931_v16 = vpop.eup %930 }
 0x240   :  { %v809_v17 = vmul.f32 -1.442695, %v712_v13  ;;  %v711_v18 = vmul.f32 %v707_v15, %v695_v14  ;;  %v710_v20 = vadd.f32 1.0, %v931_v16 }
 0x241   :  { %v933_v21 = vpop.eup %932 }
 0x242   :  { %934 = vpow2.f32 %v809_v17  ;;  %v808_v22 = vmul.f32 -1.442695, %v711_v18  ;;  %v714_v23 = vmul.f32 %v710_v20, %v698_v19  ;;  %v709_v25 = vadd.f32 1.0, %v933_v21 }
 0x244   :  { %936 = vpow2.f32 %v808_v22  ;;  %v811_v26 = vmul.f32 -1.442695, %v714_v23  ;;  %v713_v27 = vmul.f32 %v709_v25, %v697_v24 }
 0x246   :  { %938 = vpow2.f32 %v811_v26  ;;  %v810_v28 = vmul.f32 -1.442695, %v713_v27 }
 0x248   :  { %940 = vpow2.f32 %v810_v28 }
 0x24f   :  { %v935_v29 = vpop.eup %934 }
 0x250   :  { %v728_v30 = vadd.f32 1.0, %v935_v29 }
 0x251   :  { %v937_v31 = vpop.eup %936 }
 0x252   :  { %942 = vrcp.f32 %v728_v30  ;;  %v727_v32 = vadd.f32 1.0, %v937_v31 }
 0x253   :  { %v939_v33 = vpop.eup %938 }
 0x254   :  { %944 = vrcp.f32 %v727_v32  ;;  %v730_v34 = vadd.f32 1.0, %v939_v33 }
 0x255   :  { %v941_v35 = vpop.eup %940 }
 0x256   :  { %946 = vrcp.f32 %v730_v34  ;;  %v729_v36 = vadd.f32 1.0, %v941_v35 }
 0x258   :  { %948 = vrcp.f32 %v729_v36 }
 0x25f   :  { %v943_v37 = vpop.eup %942 }
 0x260   :  { %740 = vst [vmem:[#allocation2 + $0x8] sm:$0xff] %v943_v37 }
 0x261   :  { %v945_v38 = vpop.eup %944 }
 0x262   :  { %739 = vst [vmem:[#allocation2] sm:$0xff] %v945_v38 }
 0x263   :  { %v947_v39 = vpop.eup %946 }
 0x264   :  { %742 = vst [vmem:[#allocation2 + $0x18] sm:$0xff] %v947_v39 }
 0x265   :  { %v949_v40 = vpop.eup %948 }
 0x266   :  { %741 = vst [vmem:[#allocation2 + $0x10] sm:$0xff] %v949_v40 }
 0x267   :  { %961 = shalt.err (!%p958_p4)
}
 0x268   :  { %s975_s23 = smov 128   ;;  %s976_s24 = smov 8  }
 0x269   :  { %754 = dma.vmem_to_hbm [thread:$0]  %s749_s6, 512, %s1154_s7, [#allocation3], %s975_s23, %s975_s23, %s976_s24  }
 0x26a   :  { %970 = dma.done.wait [#allocation3], 512  }
 0x26b   :  { %971 = vsyncadd [#allocation3], 4294966784 }
 0x26c   :  { %758 = vsyncpa [#allocation3], 1 }

</bundles_post_ra>
